<compile_context>
chip_gen: v7x
topology: tpu7x:2x2x1
jax: 0.10.0
libtpu: 0.0.40
codegen_flags: <defaults>
</compile_context>

<pallas_src>
import math

import jax
import jax.numpy as jnp
from jax.experimental import pallas as pl
from jax.experimental.pallas import tpu as pltpu


def _dma_copy_kernel(x_hbm_ref, o_hbm_ref, sem):
    # Whole-tensor HBM→HBM async copy: no VMEM staging, no grid, no per-step
    # overhead — pure DMA work at the HBM roofline.
    cp = pltpu.make_async_copy(x_hbm_ref, o_hbm_ref, sem)
    cp.start()
    cp.wait()


def identity_map(x, *args, **kwargs):
    """IdentityMap.forward(x, *args, **kwargs) -> x.

    The identity is semantically free: returning x avoids a full HBM
    read+write round-trip entirely.  Use identity_map_pallas() only when a
    fresh output buffer is mandated.
    """
    return x


def identity_map_pallas(x, *args, **kwargs):
    """IdentityMap.forward as an explicit copy into a fresh HBM buffer."""
    if x.ndim == 0 or x.size == 0:
        # Nothing to DMA; identity of a scalar/empty is itself.
        return x

    itemsize = jnp.dtype(x.dtype).itemsize
    total_bytes = math.prod(x.shape) * itemsize

    return pl.pallas_call(
        _dma_copy_kernel,
        out_shape=jax.ShapeDtypeStruct(x.shape, x.dtype),
        # Leave both operands in HBM; the kernel drives the DMA itself.
        in_specs=[pl.BlockSpec(memory_space=pl.ANY)],
        out_specs=pl.BlockSpec(memory_space=pl.ANY),
        scratch_shapes=[pltpu.SemaphoreType.DMA(())],
        # Pure-bandwidth op: read + write of the whole tensor, zero flops.
        cost_estimate=pl.CostEstimate(
            flops=0, transcendentals=0, bytes_accessed=2 * total_bytes
        ),
    )(x)


def identity_map_config():
    # Mirrors the `config` property of the PyTorch module.
    return {"mm_projector_type": "identity"}


if __name__ == "__main__":
    key = jax.random.PRNGKey(0)

    # Small shape consistent with a multimodal projector input:
    # [batch=2, seq=8, hidden=32]
    x = jax.random.normal(key, (2, 8, 32), dtype=jnp.float32)

    # True forward: pass-through (no kernel, no HBM traffic).
    y_fast = identity_map(x)
    assert y_fast is x

    # Explicit fresh-buffer copy via a single HBM→HBM DMA.
    y = identity_map_pallas(x)
    jax.block_until_ready(y)
    assert y.shape == x.shape
    assert y.dtype == x.dtype
    assert bool(jnp.all(y == x))

    # Second case: different rank/dtype to exercise the same DMA path.
    x2 = jax.random.normal(jax.random.PRNGKey(0), (4, 64, 1024), dtype=jnp.bfloat16)
    y2 = identity_map_pallas(x2)
    jax.block_until_ready(y2)
    assert y2.shape == x2.shape
    assert y2.dtype == x2.dtype
    assert bool(jnp.all(y2 == x2))

    assert identity_map_config() == {"mm_projector_type": "identity"}

    print("KERNEL_OK")
</pallas_src>

<mosaic_0001>
module attributes {stable_mosaic.version = 11 : i64} {
  func.func @_dma_copy_kernel(%arg0: memref<2x8x32xf32, #tpu.memory_space<any>>, %arg1: memref<2x8x32xf32, #tpu.memory_space<any>>, %arg2: memref<!tpu.dma_semaphore, #tpu.memory_space<semaphore_mem>>) attributes {dimension_semantics = [], scalar_prefetch = 0 : i64, scratch_operands = 1 : i64, tpu.core_type = #tpu.core_type<tc>} {
    tpu.enqueue_dma source(%arg0 : memref<2x8x32xf32, #tpu.memory_space<any>>) target(%arg1 : memref<2x8x32xf32, #tpu.memory_space<any>>) target_semaphore(%arg2 : memref<!tpu.dma_semaphore, #tpu.memory_space<semaphore_mem>>)
    tpu.wait_dma2 semaphore(%arg2 : memref<!tpu.dma_semaphore, #tpu.memory_space<semaphore_mem>>) src(%arg0 : memref<2x8x32xf32, #tpu.memory_space<any>>) dst(%arg1 : memref<2x8x32xf32, #tpu.memory_space<any>>)
    return
  }
}

</mosaic_0001>

<bundles_post_ra>
// kernel: tpu_custom_call.1
= control target key start
LH: loop header
LB: loop body
LE: loop exit
PB: predicated region body
PF: predicated region fallthrough
CT: control target
= control target key end

     0   :  { %s35_s6 = smov [#allocation2]   ;;  %s36_s7 = smov [#allocation3]   ;;  %s54_s0 = inlined_call_operand.hbm [shape: f32[2,8,32], index: 0, kind: input, shape index: {}]   ;;  %s55_s1 = inlined_call_operand.hbm [shape: f32[2,8,32], index: 1, kind: output, shape index: {}]  }
   0x1   :  { %s37_s8 = smov 0  }
   0x2   :  { %18 = dma.general %s54_s0, 256, %s55_s1, %s35_s6, %s36_s7, [#allocation4], %s37_s8, 0  }
   0x3   :  { %33 = dma.done.wait [#allocation2], 256 }
   0x4   :  { %34 = vsyncadd [#allocation2], 4294967040 }
   0x5   :  { %23 = vsyncmov [#allocation2] }
   0x8   :  { %s24_s13 = vpop.sfrf %23 }
   0x9   :  { %p29_p0 = scmp.ne.s32.totalorder %s24_s13, 0 }
   0xb   :  { %28 = shalt.err (%p29_p0)  }

</bundles_post_ra>
